<compile_context>
chip_gen: v7x
topology: tpu7x:2x2x1
jax: 0.10.0
libtpu: 0.0.40
codegen_flags: <defaults>
</compile_context>

<pallas_src>
import functools
import math

import jax
import jax.numpy as jnp
from jax.experimental import pallas as pl
from jax.experimental.pallas import tpu as pltpu

_EPS = 1e-5


def _ln_kernel(x_ref, w_ref, b_ref, o_ref):
    """Generic LayerNorm tile: normalize over the last (lane) axis."""
    x = x_ref[...].astype(jnp.float32)
    mu = jnp.mean(x, axis=-1, keepdims=True)
    xc = x - mu
    # unbiased=False -> divide by C, matching torch.var(..., unbiased=False)
    var = jnp.mean(xc * xc, axis=-1, keepdims=True)
    inv = jax.lax.rsqrt(var + _EPS)
    w = w_ref[...].astype(jnp.float32)
    b = b_ref[...].astype(jnp.float32)
    o_ref[...] = (xc * inv * w + b).astype(o_ref.dtype)


def _ln_packed_kernel(x_ref, w_ref, b_ref, g_ref, o_ref):
    """Lane-packed LayerNorm tile.

    Tile is (tm, 128) with G = 128 // C original rows packed per lane-row.
    g_ref is a (128, 128) block-diagonal matrix with 1/C in same-group
    positions, so x @ g broadcasts each original row's mean back onto its own
    lanes.  Keeps loads/stores lane-dense (no masked vst) and does the
    reduction on the otherwise-idle MXU.
    """
    x = x_ref[...].astype(jnp.float32)
    gm = g_ref[...]
    mu = jnp.dot(x, gm, precision=jax.lax.Precision.HIGHEST,
                 preferred_element_type=jnp.float32)
    xc = x - mu
    var = jnp.dot(xc * xc, gm, precision=jax.lax.Precision.HIGHEST,
                  preferred_element_type=jnp.float32)
    inv = jax.lax.rsqrt(var + _EPS)
    w = w_ref[...].astype(jnp.float32)
    b = b_ref[...].astype(jnp.float32)
    o_ref[...] = (xc * inv * w + b).astype(o_ref.dtype)


def _pick_block_rows(rows, width, in_itemsize, out_itemsize, requested):
    """Largest row-tile that fits a ~40 MiB scoped-VMEM budget (v7x-safe)."""
    budget = 40 * 1024 * 1024
    # double-buffered input + output tiles, plus ~6 f32 temporaries per element
    bytes_per_row = width * (2 * in_itemsize + 2 * out_itemsize + 6 * 4)
    max_rows = max(8, budget // bytes_per_row)
    sub = 16 if min(in_itemsize, out_itemsize) < 4 else 8  # bf16 sublane packing
    br = max(sub, (min(requested, max_rows) // sub) * sub)
    if rows <= br:
        return int(rows)  # single block equal to the full extent (always legal)
    return int(br)


@functools.partial(jax.jit, static_argnames=("block_rows",))
def withbias_layernorm(x, weight, bias, block_rows=512):
    """LayerNorm over the last axis with affine (weight, bias), eps=1e-5."""
    orig_shape = x.shape
    c = orig_shape[-1]
    rows = math.prod(orig_shape[:-1]) if len(orig_shape) > 1 else 1
    out_dtype = x.dtype
    itemsize = jnp.dtype(x.dtype).itemsize

    # Lane-pack small C so every vreg / store is fully lane-dense.
    use_pack = (c < 128) and (128 % c == 0) and (rows % (128 // c) == 0)

    if use_pack:
        g = 128 // c
        width = 128
        rows_p = rows // g
        x2 = x.reshape(rows_p, width)                      # pure reshape, no pad
        w2 = jnp.tile(weight.reshape(-1), g).reshape(1, width)
        b2 = jnp.tile(bias.reshape(-1), g).reshape(1, width)
        lane = jnp.arange(width, dtype=jnp.int32)
        gmat = ((lane[:, None] // c) == (lane[None, :] // c)).astype(jnp.float32) / c
    else:
        width = c
        rows_p = rows
        x2 = x.reshape(rows_p, width)
        w2 = weight.reshape(1, width)
        b2 = bias.reshape(1, width)

    br = _pick_block_rows(rows_p, width, itemsize, itemsize, block_rows)
    grid = (pl.cdiv(rows_p, br),)   # no wrapper pad: OOB edge-block writes drop

    x_spec = pl.BlockSpec((br, width), lambda i: (i, 0))
    o_spec = pl.BlockSpec((br, width), lambda i: (i, 0))
    p_spec = pl.BlockSpec((1, width), lambda i: (0, 0))   # loaded once, stays resident

    tile_bytes = br * width * 2 * itemsize                 # one in + one out tile
    vmem_limit = int(min(48 * 1024 * 1024,                 # <= v7x 64 MiB physical
                         max(16 * 1024 * 1024,
                             2 * tile_bytes + 6 * br * width * 4 + (2 << 20))))

    compiler_params = pltpu.CompilerParams(
        dimension_semantics=("parallel",),
        vmem_limit_bytes=vmem_limit,
    )

    if use_pack:
        out = pl.pallas_call(
            _ln_packed_kernel,
            out_shape=jax.ShapeDtypeStruct((rows_p, width), out_dtype),
            grid_spec=pltpu.PrefetchScalarGridSpec(
                num_scalar_prefetch=0,
                grid=grid,
                in_specs=[x_spec, p_spec, p_spec,
                          pl.BlockSpec((width, width), lambda i: (0, 0))],
                out_specs=o_spec,
            ),
            compiler_params=compiler_params,
        )(x2, w2, b2, gmat)
    else:
        out = pl.pallas_call(
            _ln_kernel,
            out_shape=jax.ShapeDtypeStruct((rows_p, width), out_dtype),
            grid_spec=pltpu.PrefetchScalarGridSpec(
                num_scalar_prefetch=0,
                grid=grid,
                in_specs=[x_spec, p_spec, p_spec],
                out_specs=o_spec,
            ),
            compiler_params=compiler_params,
        )(x2, w2, b2)

    return out.reshape(orig_shape)


def reference_layernorm(x, weight, bias):
    x32 = x.astype(jnp.float32)
    mu = jnp.mean(x32, axis=-1, keepdims=True)
    var = jnp.mean((x32 - mu) ** 2, axis=-1, keepdims=True)
    y = (x32 - mu) / jnp.sqrt(var + 1e-5) * weight.astype(jnp.float32) \
        + bias.astype(jnp.float32)
    return y.astype(x.dtype)


if __name__ == "__main__":
    key = jax.random.PRNGKey(0)
    k_x, k_w, k_b, k_x2, k_x3 = jax.random.split(key, 5)

    # Primary case consistent with the module: hidden=32, leading (batch=2, seq=8).
    batch, seq, hidden = 2, 8, 32
    x = jax.random.normal(k_x, (batch, seq, hidden), dtype=jnp.float32)
    weight = 1.0 + 0.1 * jax.random.normal(k_w, (hidden,), dtype=jnp.float32)
    bias = 0.1 * jax.random.normal(k_b, (hidden,), dtype=jnp.float32)

    y = jax.block_until_ready(withbias_layernorm(x, weight, bias))
    assert y.shape == x.shape
    assert jnp.allclose(y, reference_layernorm(x, weight, bias),
                        atol=1e-5, rtol=1e-5), "packed-path mismatch"

    # Generic fallback path (C does not divide 128).
    c2 = 48
    x2 = jax.random.normal(k_x2, (2, 8, c2), dtype=jnp.float32)
    w2 = jnp.ones((c2,), jnp.float32)
    b2 = jnp.zeros((c2,), jnp.float32)
    y2 = jax.block_until_ready(withbias_layernorm(x2, w2, b2))
    assert jnp.allclose(y2, reference_layernorm(x2, w2, b2),
                        atol=1e-5, rtol=1e-5), "generic-path mismatch"

    # Multi-block grid with a non-divisible (masked) edge block, no wrapper pad.
    x3 = jax.random.normal(k_x3, (2, 100, hidden), dtype=jnp.float32)
    y3 = jax.block_until_ready(withbias_layernorm(x3, weight, bias, block_rows=16))
    assert jnp.allclose(y3, reference_layernorm(x3, weight, bias),
                        atol=1e-5, rtol=1e-5), "masked-edge mismatch"

    print("KERNEL_OK")
</pallas_src>

<mosaic_0001>
module attributes {stable_mosaic.version = 11 : i64} {
  func.func @_ln_packed_kernel(%arg0: i32, %arg1: memref<4x128xf32, #tpu.memory_space<vmem>>, %arg2: memref<1x128xf32, #tpu.memory_space<vmem>>, %arg3: memref<1x128xf32, #tpu.memory_space<vmem>>, %arg4: memref<128x128xf32, #tpu.memory_space<vmem>>, %arg5: memref<4x128xf32, #tpu.memory_space<vmem>>) attributes {dimension_semantics = [#tpu.dimension_semantics<parallel>], iteration_bounds = array<i64: 1>, scalar_prefetch = 0 : i64, scratch_operands = 0 : i64, tpu.core_type = #tpu.core_type<tc>, window_params = [{transform_indices = @transform_0, window_bounds = array<i64: 4, 128>}, {pipeline_mode = #tpu.pipeline_mode<synchronous>, transform_indices = @transform_1, window_bounds = array<i64: 1, 128>}, {pipeline_mode = #tpu.pipeline_mode<synchronous>, transform_indices = @transform_2, window_bounds = array<i64: 1, 128>}, {pipeline_mode = #tpu.pipeline_mode<synchronous>, transform_indices = @transform_3, window_bounds = array<i64: 128, 128>}, {transform_indices = @transform_4, window_bounds = array<i64: 4, 128>}]} {
    %c0 = arith.constant 0 : index
    %c0_0 = arith.constant 0 : index
    %0 = vector.load %arg1[%c0, %c0_0] : memref<4x128xf32, #tpu.memory_space<vmem>>, vector<4x128xf32>
    %c0_1 = arith.constant 0 : index
    %c0_2 = arith.constant 0 : index
    %1 = vector.load %arg4[%c0_1, %c0_2] : memref<128x128xf32, #tpu.memory_space<vmem>>, vector<128x128xf32>
    %cst = arith.constant dense<0.000000e+00> : vector<4x128xf32>
    %2 = tpu.matmul %0, %1, %cst {dimension_numbers = #tpu.dot_dimension_numbers<[1], [0], [0], [1], [0, 0, 1, 1], [], []>, precision = #tpu.contract_precision<fp32>} : vector<4x128xf32>, vector<128x128xf32>, vector<4x128xf32> -> vector<4x128xf32>
    %3 = arith.subf %0, %2 : vector<4x128xf32>
    %4 = arith.mulf %3, %3 : vector<4x128xf32>
    %cst_3 = arith.constant dense<0.000000e+00> : vector<4x128xf32>
    %5 = tpu.matmul %4, %1, %cst_3 {dimension_numbers = #tpu.dot_dimension_numbers<[1], [0], [0], [1], [0, 0, 1, 1], [], []>, precision = #tpu.contract_precision<fp32>} : vector<4x128xf32>, vector<128x128xf32>, vector<4x128xf32> -> vector<4x128xf32>
    %cst_4 = arith.constant 9.99999974E-6 : f32
    %6 = vector.broadcast %cst_4 : f32 to vector<4x128xf32>
    %7 = arith.addf %5, %6 : vector<4x128xf32>
    %8 = math.rsqrt %7 : vector<4x128xf32>
    %c0_5 = arith.constant 0 : index
    %c0_6 = arith.constant 0 : index
    %9 = vector.load %arg2[%c0_5, %c0_6] : memref<1x128xf32, #tpu.memory_space<vmem>>, vector<1x128xf32>
    %c0_7 = arith.constant 0 : index
    %c0_8 = arith.constant 0 : index
    %10 = vector.load %arg3[%c0_7, %c0_8] : memref<1x128xf32, #tpu.memory_space<vmem>>, vector<1x128xf32>
    %11 = arith.mulf %3, %8 : vector<4x128xf32>
    %12 = vector.broadcast %9 : vector<1x128xf32> to vector<4x128xf32>
    %13 = arith.mulf %11, %12 : vector<4x128xf32>
    %14 = vector.broadcast %10 : vector<1x128xf32> to vector<4x128xf32>
    %15 = arith.addf %13, %14 : vector<4x128xf32>
    %c0_9 = arith.constant 0 : index
    %c0_10 = arith.constant 0 : index
    %16 = vector.load %arg5[%c0_9, %c0_10] : memref<4x128xf32, #tpu.memory_space<vmem>>, vector<4x128xf32>
    tpu.vector_store %arg5[%c0_9, %c0_10], %15 {strides = array<i32>} : memref<4x128xf32, #tpu.memory_space<vmem>>, vector<4x128xf32>,
    return
  }
  func.func @transform_0(%arg0: i32) -> (i32, i32) {
    %c0_i32 = arith.constant 0 : i32
    %c0_i32_0 = arith.constant 0 : i32
    return %arg0, %c0_i32 : i32, i32
  }
  func.func @transform_1(%arg0: i32) -> (i32, i32) {
    %c0_i32 = arith.constant 0 : i32
    %c0_i32_0 = arith.constant 0 : i32
    %c0_i32_1 = arith.constant 0 : i32
    return %c0_i32, %c0_i32_0 : i32, i32
  }
  func.func @transform_2(%arg0: i32) -> (i32, i32) {
    %c0_i32 = arith.constant 0 : i32
    %c0_i32_0 = arith.constant 0 : i32
    %c0_i32_1 = arith.constant 0 : i32
    return %c0_i32, %c0_i32_0 : i32, i32
  }
  func.func @transform_3(%arg0: i32) -> (i32, i32) {
    %c0_i32 = arith.constant 0 : i32
    %c0_i32_0 = arith.constant 0 : i32
    %c0_i32_1 = arith.constant 0 : i32
    return %c0_i32, %c0_i32_0 : i32, i32
  }
  func.func @transform_4(%arg0: i32) -> (i32, i32) {
    %c0_i32 = arith.constant 0 : i32
    %c0_i32_0 = arith.constant 0 : i32
    return %arg0, %c0_i32 : i32, i32
  }
}

</mosaic_0001>

<bundles_post_ra>
// kernel: tile.13
= control target key start
LH: loop header
LB: loop body
LE: loop exit
PB: predicated region body
PF: predicated region fallthrough
CT: control target
= control target key end

     0   :  { %s22_s0 = inlined_call_operand.vmem [shape: f32[32], index: 0, kind: input, shape index: {}]   ;;  %s23_s1 = inlined_call_operand.vmem [shape: f32[4,32], index: 1, kind: output, shape index: {}]  }
   0x1   :  { %v4_v0 = vld [vmem:[%s22_s0] ss:$0 sm:$0xff] }
   0x2   :  { %5 = vst [vmem:[%s23_s1] sm:$0xf] %v4_v0 }

// kernel: tile.14
= control target key start
LH: loop header
LB: loop body
LE: loop exit
PB: predicated region body
PF: predicated region fallthrough
CT: control target
= control target key end

     0   :  { %vm7_vm0 = vcmask 261120   ;;  %s37_s8 = smov 32   ;;  %s38_s9 = smov 64   ;;  %vm13_vm1 = vcmask 1048320   ;;  %vm19_vm2 = vcmask 785920   ;;  %vm25_vm3 = vcmask 523520   ;;  %s55_s0 = inlined_call_operand.vmem [shape: f32[4,32], index: 0, kind: input, shape index: {}]   ;;  %s56_s1 = inlined_call_operand.vmem [shape: f32[1,128], index: 1, kind: output, shape index: {}]  }
   0x1   :  { %v4_v0 = vld [vmem:[%s55_s0] sm:$0xf]  ;;  %s36_s0 = smov 96  }
   0x2   :  { %5 = vst [vmem:[#allocation1] sm:$0xf] %v4_v0 }
   0x9   :  { %v10_v1 = vld [vmem:[#allocation1 + $0x3] sm:$0x1]   ;;  %v22_v2 = vld [vmem:[#allocation1 + $0x1] sm:$0x1]   ;;  %v6_v3 = vld [vmem:[#allocation1] sm:$0x1]  }
   0xa   :  { %11 = vrot.lane.b32.xlu0 %v10_v1, %s36_s0  ;;  %23 = vrot.lane.b32.xlu1 %v22_v2, %s37_s8  ;;  %v16_v4 = vld [vmem:[#allocation1 + $0x2] sm:$0x1]   ;;  %8 = vst.msk [vmem:[#allocation0] sm:$0x1] %vm7_vm0, %v6_v3  }
   0xe   :  { %17 = vrot.lane.b32.xlu0 %v16_v4, %s38_s9 }
  0x7c   :  { %v12_v5 = vpop.permute.xlu0 %11   ;;  %v24_v6 = vpop.permute.xlu1 %23  }
  0x7d   :  { %14 = vst.msk [vmem:[#allocation0] sm:$0x1] %vm13_vm1, %v12_v5  }
  0x80   :  { %v18_v7 = vpop.permute.xlu0 %17  }
  0x81   :  { %20 = vst.msk [vmem:[#allocation0] sm:$0x1] %vm19_vm2, %v18_v7  }
  0x82   :  { %26 = vst.msk [vmem:[#allocation0] sm:$0x1] %vm25_vm3, %v24_v6  }
  0x89   :  { %v30_v8 = vld [vmem:[#allocation0] sm:$0x1] }
  0x8a   :  { %32 = vst [vmem:[%s56_s1] sm:$0x1] %v30_v8 }

// kernel: withbias_layernorm.1
= control target key start
LH: loop header
LB: loop body
LE: loop exit
PB: predicated region body
PF: predicated region fallthrough
CT: control target
= control target key end

     0   :  { %v2281_v0 = vmov 0.0|0.0   ;;  %vm2282_vm0 = vmmov 0   ;;  %v2283_v4 = vmov 0.0   ;;  %s2760_s3 = inlined_call_operand.vmem [shape: f32[128,128], index: 3, kind: input, shape index: {}]   ;;  %s2761_s0 = inlined_call_operand.vmem [shape: f32[4,128], index: 0, kind: input, shape index: {}]   ;;  %s2762_s1 = inlined_call_operand.vmem [shape: f32[1,128], index: 1, kind: input, shape index: {}]   ;;  %s2763_s2 = inlined_call_operand.vmem [shape: f32[1,128], index: 2, kind: input, shape index: {}]   ;;  %s2764_s4 = inlined_call_operand.vmem [shape: f32[4,128], index: 4, kind: output, shape index: {}]  }
   0x1   :  { %1967 = vmatprep.subr.bf16.mxu0 %v2281_v0  ;;  %v18_v1 = vld [vmem:[%s2760_s3] sm:$0xff]  ;;  %v19_v2 = vld [vmem:[%s2760_s3 + $0x8] sm:$0xff]  ;;  %v20_v3 = vld [vmem:[%s2760_s3 + $0x10] sm:$0xff]  ;;  %1579 = vmatprep.mubr.msk.f32.mxu0 %vm2282_vm0, %v2283_v4 }
   0x2   :  { %v35_v5 = vand.u32 4294901760, %v18_v1  ;;  %v38_v6 = vand.u32 4294901760, %v19_v2  ;;  %v21_v7 = vld [vmem:[%s2760_s3 + $0x18] sm:$0xff]  ;;  %v41_v8 = vand.u32 4294901760, %v20_v3  ;;  %2111 = vmatprep.subr.bf16.mxu1 %v2281_v0  ;;  %1789 = vmatprep.mubr.msk.f32.mxu1 %vm2282_vm0, %v2283_v4  ;;  %v22_v10 = vld [vmem:[%s2760_s3 + $0x20] sm:$0xff]  ;;  %v23_v11 = vld [vmem:[%s2760_s3 + $0x28] sm:$0xff] }
   0x3   :  { %v44_v9 = vand.u32 4294901760, %v21_v7  ;;  %v47_v14 = vand.u32 4294901760, %v22_v10  ;;  %v50_v15 = vand.u32 4294901760, %v23_v11  ;;  %v24_v16 = vld [vmem:[%s2760_s3 + $0x30] sm:$0xff]  ;;  %v25_v17 = vld [vmem:[%s2760_s3 + $0x38] sm:$0xff]  ;;  %v26_v21 = vld [vmem:[%s2760_s3 + $0x40] sm:$0xff] }
   0x4   :  { %v2333_v12 = vpack.c.bf16 %v38_v6, %v35_v5  ;;  %v53_v19 = vand.u32 4294901760, %v24_v16  ;;  %v56_v20 = vand.u32 4294901760, %v25_v17  ;;  %v2356_v22 = vld [vmem:[%s2761_s0] sm:$0xf]  ;;  %v27_v23 = vld [vmem:[%s2760_s3 + $0x48] sm:$0xff]  ;;  %v28_v24 = vld [vmem:[%s2760_s3 + $0x50] sm:$0xff]  ;;  %v2388_v34 = vsub.f32 %v18_v1, %v35_v5 }
   0x5   :  { %v2336_v13 = vpack.c.bf16 %v44_v9, %v41_v8  ;;  %v2348_v18 = vpack.c.bf16 %v50_v15, %v47_v14  ;;  %v29_v25 = vld [vmem:[%s2760_s3 + $0x58] sm:$0xff]  ;;  %v30_v26 = vld [vmem:[%s2760_s3 + $0x60] sm:$0xff]  ;;  %v59_v27 = vand.u32 4294901760, %v26_v21  ;;  %v31_v28 = vld [vmem:[%s2760_s3 + $0x68] sm:$0xff]  ;;  %v2383_v31 = vand.u32 4294901760, %v2356_v22 }
   0x6   :  { %1969 = vmatpush3.bf16.msra.mxu0 %v2333_v12  ;;  %2113 = vmatpush3.bf16.msra.mxu1 %v2333_v12  ;;  %v32_v29 = vld [vmem:[%s2760_s3 + $0x70] sm:$0xff]  ;;  %v33_v30 = vld [vmem:[%s2760_s3 + $0x78] sm:$0xff]  ;;  %v2386_v32 = vpack.c.bf16 %v56_v20, %v53_v19  ;;  %v62_v33 = vand.u32 4294901760, %v27_v23  ;;  %v2390_v35 = vsub.f32 %v19_v2, %v38_v6  ;;  %v65_v36 = vand.u32 4294901760, %v28_v24 }
   0x7   :  { %1970 = vmatprep.subr.bf16.mxu0 %v2281_v0  ;;  %2114 = vmatprep.subr.bf16.mxu1 %v2281_v0  ;;  %v68_v37 = vand.u32 4294901760, %v29_v25  ;;  %v71_v38 = vand.u32 4294901760, %v30_v26  ;;  %v74_v39 = vand.u32 4294901760, %v31_v28  ;;  %v77_v40 = vand.u32 4294901760, %v32_v29 }
   0x8   :  { %v80_v41 = vand.u32 4294901760, %v33_v30  ;;  %v2397_v42 = vsub.f32 %v2356_v22, %v2383_v31  ;;  %v2399_v43 = vsub.f32 %v20_v3, %v41_v8  ;;  %v2402_v44 = vpack.c.bf16 %v62_v33, %v59_v27 }
   0x9   :  { %v128_v45 = vand.u32 4294901760, %v2388_v34  ;;  %v135_v46 = vand.u32 4294901760, %v2390_v35  ;;  %v2406_v47 = vsub.f32 %v21_v7, %v44_v9  ;;  %v2410_v48 = vsub.f32 %v22_v10, %v47_v14 }
   0xa   :  { %1972 = vmatpush3.bf16.msra.mxu0 %v2336_v13  ;;  %2116 = vmatpush3.bf16.msra.mxu1 %v2336_v13  ;;  %v2413_v49 = vpack.c.bf16 %v68_v37, %v65_v36  ;;  %v2415_v50 = vpack.c.bf16 %v74_v39, %v71_v38  ;;  %v2417_v51 = vpack.c.bf16 %v80_v41, %v77_v40  ;;  %v117_v52 = vand.u32 4294901760, %v2397_v42 }
   0xb   :  { %1973 = vmatprep.subr.bf16.mxu0 %v2281_v0  ;;  %2117 = vmatprep.subr.bf16.mxu1 %v2281_v0  ;;  %v142_v53 = vand.u32 4294901760, %v2399_v43  ;;  %v2421_v54 = vsub.f32 %v23_v11, %v50_v15  ;;  %v2423_v55 = vsub.f32 %v24_v16, %v53_v19  ;;  %v129_v56 = vsub.f32 %v2388_v34, %v128_v45 }
   0xc   :  { %v136_v57 = vsub.f32 %v2390_v35, %v135_v46  ;;  %v149_v58 = vand.u32 4294901760, %v2406_v47  ;;  %v2429_v59 = vsub.f32 %v25_v17, %v56_v20  ;;  %v156_v60 = vand.u32 4294901760, %v2410_v48 }
   0xd   :  { %v2434_v61 = vsub.f32 %v26_v21, %v59_v27  ;;  %v2436_v62 = vsub.f32 %v27_v23, %v62_v33  ;;  %v2438_v63 = vsub.f32 %v28_v24, %v65_v36  ;;  %v2441_v1 = vsub.f32 %v29_v25, %v68_v37 }
   0xe   :  { %1975 = vmatpush3.bf16.msra.mxu0 %v2348_v18  ;;  %2119 = vmatpush3.bf16.msra.mxu1 %v2348_v18  ;;  %v2443_v2 = vsub.f32 %v30_v26, %v71_v38  ;;  %v2445_v3 = vsub.f32 %v31_v28, %v74_v39  ;;  %v2447_v5 = vsub.f32 %v32_v29, %v77_v40  ;;  %v163_v8 = vand.u32 4294901760, %v2421_v54 }
   0xf   :  { %1976 = vmatprep.subr.bf16.mxu0 %v2281_v0  ;;  %2120 = vmatprep.subr.bf16.mxu1 %v2281_v0  ;;  %v118_v6 = vsub.f32 %v2397_v42, %v117_v52  ;;  %v143_v7 = vsub.f32 %v2399_v43, %v142_v53  ;;  %v2454_v9 = vsub.f32 %v33_v30, %v80_v41  ;;  %v130_v10 = vand.u32 4294901760, %v129_v56 }
  0x10   :  { %v137_v11 = vand.u32 4294901760, %v136_v57  ;;  %v150_v14 = vsub.f32 %v2406_v47, %v149_v58  ;;  %v170_v15 = vand.u32 4294901760, %v2423_v55  ;;  %v177_v16 = vand.u32 4294901760, %v2429_v59 }
  0x11   :  { %v184_v17 = vand.u32 4294901760, %v2434_v61  ;;  %v191_v19 = vand.u32 4294901760, %v2436_v62  ;;  %v198_v20 = vand.u32 4294901760, %v2438_v63  ;;  %v205_v21 = vand.u32 4294901760, %v2441_v1 }
  0x12   :  { %1978 = vmatpush3.bf16.msra.mxu0 %v2386_v32  ;;  %2122 = vmatpush3.bf16.msra.mxu1 %v2386_v32  ;;  %v212_v23 = vand.u32 4294901760, %v2443_v2  ;;  %v219_v24 = vand.u32 4294901760, %v2445_v3  ;;  %v226_v25 = vand.u32 4294901760, %v2447_v5  ;;  %v233_v26 = vand.u32 4294901760, %v2454_v9 }
  0x13   :  { %1979 = vmatprep.subr.bf16.mxu0 %v2281_v0  ;;  %2123 = vmatprep.subr.bf16.mxu1 %v2281_v0  ;;  %v2471_v27 = vpack.c.bf16 %v135_v46, %v128_v45  ;;  %v2473_v28 = vpack.c.bf16 %v149_v58, %v142_v53  ;;  %v2475_v29 = vpack.c.bf16 %v163_v8, %v156_v60  ;;  %v119_v39 = vand.u32 4294901760, %v118_v6 }
  0x14   :  { %v2478_v30 = vpack.c.bf16 %v177_v16, %v170_v15  ;;  %v2480_v33 = vpack.c.bf16 %v191_v19, %v184_v17  ;;  %v2482_v36 = vpack.c.bf16 %v205_v21, %v198_v20  ;;  %v2484_v37 = vpack.c.bf16 %v219_v24, %v212_v23 }
  0x15   :  { %v2487_v38 = vpack.c.bf16 %v233_v26, %v226_v25  ;;  %v157_v40 = vsub.f32 %v2410_v48, %v156_v60  ;;  %v2493_v41 = vpack.c.bf16 %v137_v11, %v130_v10  ;;  %v144_v45 = vand.u32 4294901760, %v143_v7 }
  0x16   :  { %1981 = vmatpush3.bf16.msra.mxu0 %v2402_v44  ;;  %2125 = vmatpush3.bf16.msra.mxu1 %v2402_v44  ;;  %v151_v46 = vand.u32 4294901760, %v150_v14  ;;  %v164_v53 = vsub.f32 %v2421_v54, %v163_v8  ;;  %v171_v56 = vsub.f32 %v2423_v55, %v170_v15  ;;  %v178_v6 = vsub.f32 %v2429_v59, %v177_v16 }
  0x17   :  { %1982 = vmatprep.subr.bf16.mxu0 %v2281_v0  ;;  %2126 = vmatprep.subr.bf16.mxu1 %v2281_v0  ;;  %v158_v58 = vand.u32 4294901760, %v157_v40  ;;  %v185_v11 = vsub.f32 %v2434_v61, %v184_v17  ;;  %v192_v14 = vsub.f32 %v2436_v62, %v191_v19  ;;  %v199_v15 = vsub.f32 %v2438_v63, %v198_v20 }
  0x18   :  { %v2501_v57 = vpack.c.bf16 %v151_v46, %v144_v45  ;;  %v165_v60 = vand.u32 4294901760, %v164_v53  ;;  %v172_v7 = vand.u32 4294901760, %v171_v56  ;;  %v179_v10 = vand.u32 4294901760, %v178_v6 }
  0x19   :  { %v193_v40 = vand.u32 4294901760, %v192_v14  ;;  %v206_v45 = vsub.f32 %v2441_v1, %v205_v21  ;;  %v213_v46 = vsub.f32 %v2443_v2, %v212_v23  ;;  %v200_v19 = vand.u32 4294901760, %v199_v15 }
  0x1a   :  { %1984 = vmatpush3.bf16.msra.mxu0 %v2413_v49  ;;  %2128 = vmatpush3.bf16.msra.mxu1 %v2413_v49  ;;  %v2508_v8 = vpack.c.bf16 %v165_v60, %v158_v58  ;;  %v2515_v16 = vpack.c.bf16 %v179_v10, %v172_v7  ;;  %v220_v20 = vsub.f32 %v2445_v3, %v219_v24 }
  0x1b   :  { %1985 = vmatprep.subr.bf16.mxu0 %v2281_v0  ;;  %2129 = vmatprep.subr.bf16.mxu1 %v2281_v0  ;;  %v207_v53 = vand.u32 4294901760, %v206_v45  ;;  %v227_v56 = vsub.f32 %v2447_v5, %v226_v25  ;;  %v214_v21 = vand.u32 4294901760, %v213_v46  ;;  %v234_v23 = vsub.f32 %v2454_v9, %v233_v26 }
  0x1c   :  { %v221_v60 = vand.u32 4294901760, %v220_v20  ;;  %v2542_v26 = vpack.c.bf16 %v2390_v35, %v2388_v34  ;;  %v2549_v10 = vpack.c.bf16 %v2406_v47, %v2399_v43  ;;  %v2557_v34 = vpack.c.bf16 %v2421_v54, %v2410_v48 }
  0x1d   :  { %v2527_v58 = vpack.c.bf16 %v207_v53, %v200_v19  ;;  %v228_v7 = vand.u32 4294901760, %v227_v56  ;;  %v235_v24 = vand.u32 4294901760, %v234_v23  ;;  %v2563_v35 = vpack.c.bf16 %v2429_v59, %v2423_v55 }
  0x1e   :  { %1987 = vmatpush3.bf16.msra.mxu0 %v2415_v50  ;;  %2131 = vmatpush3.bf16.msra.mxu1 %v2415_v50  ;;  %v2532_v6 = vpack.c.bf16 %v221_v60, %v214_v21  ;;  %v2569_v43 = vpack.c.bf16 %v2436_v62, %v2434_v61  ;;  %v2575_v47 = vpack.c.bf16 %v2441_v1, %v2438_v63 }
  0x1f   :  { %1988 = vmatprep.subr.bf16.mxu0 %v2281_v0  ;;  %2132 = vmatprep.subr.bf16.mxu1 %v2281_v0  ;;  %v2536_v25 = vpack.c.bf16 %v235_v24, %v228_v7  ;;  %v2581_v48 = vpack.c.bf16 %v2445_v3, %v2443_v2  ;;  %v2587_v54 = vpack.c.bf16 %v2454_v9, %v2447_v5 }
  0x22   :  { %1990 = vmatpush3.bf16.msra.mxu0 %v2417_v51  ;;  %2134 = vmatpush3.bf16.msra.mxu1 %v2417_v51 }
  0x23   :  { %1991 = vmatprep.subr.bf16.mxu0 %v2281_v0  ;;  %2135 = vmatprep.subr.bf16.mxu1 %v2281_v0 }
  0x25   :  { %1580 = vmatmul.mubr.f32.vlgmr.msra.gmra.mrb[0].mxu0 %v119_v39  ;;  %v186_v39 = vand.u32 4294901760, %v185_v11 }
  0x26   :  { %1993 = vmatpush3.bf16.msra.mxu0 %v2493_v41  ;;  %1614 = vmatprep.mubr.msk.f32.mxu0 %vm2282_vm0, %v2283_v4 }
  0x27   :  { %1994 = vmatprep.subr.bf16.mxu0 %v2281_v0  ;;  %v2521_v17 = vpack.c.bf16 %v193_v40, %v186_v39 }
  0x2a   :  { %1996 = vmatpush3.bf16.msra.mxu0 %v2501_v57 }
  0x2b   :  { %1997 = vmatprep.subr.bf16.mxu0 %v2281_v0 }
  0x2e   :  { %1999 = vmatpush3.bf16.msra.mxu0 %v2508_v8 }
  0x2f   :  { %2000 = vmatprep.subr.bf16.mxu0 %v2281_v0 }
  0x32   :  { %2002 = vmatpush3.bf16.msra.mxu0 %v2515_v16 }
  0x33   :  { %2003 = vmatprep.subr.bf16.mxu0 %v2281_v0 }
  0x36   :  { %2005 = vmatpush3.bf16.msra.mxu0 %v2521_v17 }
  0x37   :  { %2006 = vmatprep.subr.bf16.mxu0 %v2281_v0 }
  0x3a   :  { %2008 = vmatpush3.bf16.msra.mxu0 %v2527_v58 }
  0x3b   :  { %2009 = vmatprep.subr.bf16.mxu0 %v2281_v0 }
  0x3e   :  { %2011 = vmatpush3.bf16.msra.mxu0 %v2532_v6 }
  0x3f   :  { %2012 = vmatprep.subr.bf16.mxu0 %v2281_v0 }
  0x42   :  { %2014 = vmatpush3.bf16.msra.mxu0 %v2536_v25 }
  0x43   :  { %2015 = vmatprep.subr.bf16.mxu0 %v2281_v0 }
  0x45   :  { %1615 = vmatmul.mubr.f32.vlgmr.msra.gmra.mrb[0].mxu0 %v2383_v31 }
  0x46   :  { %2017 = vmatpush3.bf16.msra.mxu0 %v2542_v26  ;;  %1649 = vmatprep.mubr.msk.f32.mxu0 %vm2282_vm0, %v2283_v4 }
  0x47   :  { %2018 = vmatprep.subr.bf16.mxu0 %v2281_v0 }
  0x4a   :  { %2020 = vmatpush3.bf16.msra.mxu0 %v2549_v10 }
  0x4b   :  { %2021 = vmatprep.subr.bf16.mxu0 %v2281_v0 }
  0x4e   :  { %2023 = vmatpush3.bf16.msra.mxu0 %v2557_v34 }
  0x4f   :  { %2024 = vmatprep.subr.bf16.mxu0 %v2281_v0 }
  0x52   :  { %2026 = vmatpush3.bf16.msra.mxu0 %v2563_v35 }
  0x53   :  { %2027 = vmatprep.subr.bf16.mxu0 %v2281_v0 }
  0x56   :  { %2029 = vmatpush3.bf16.msra.mxu0 %v2569_v43 }
  0x57   :  { %2030 = vmatprep.subr.bf16.mxu0 %v2281_v0 }
  0x5a   :  { %2032 = vmatpush3.bf16.msra.mxu0 %v2575_v47 }
  0x5b   :  { %2033 = vmatprep.subr.bf16.mxu0 %v2281_v0 }
  0x5e   :  { %2035 = vmatpush3.bf16.msra.mxu0 %v2581_v48 }
  0x5f   :  { %2036 = vmatprep.subr.bf16.mxu0 %v2281_v0 }
  0x62   :  { %2038 = vmatpush3.bf16.msra.mxu0 %v2587_v54 }
  0x63   :  { %2039 = vmatprep.subr.bf16.mxu0 %v2281_v0 }
  0x65   :  { %1650 = vmatmul.mubr.f32.vlgmr.msra.gmra.mrb[0].mxu0 %v2397_v42 }
  0x66   :  { %2041 = vmatpush3.bf16.msra.mxu0 %v2333_v12  ;;  %1684 = vmatprep.mubr.msk.f32.mxu0 %vm2282_vm0, %v2283_v4 }
  0x67   :  { %2042 = vmatprep.subr.bf16.mxu0 %v2281_v0 }
  0x6a   :  { %2044 = vmatpush3.bf16.msra.mxu0 %v2336_v13 }
  0x6b   :  { %2045 = vmatprep.subr.bf16.mxu0 %v2281_v0 }
  0x6e   :  { %2047 = vmatpush3.bf16.msra.mxu0 %v2348_v18 }
  0x6f   :  { %2048 = vmatprep.subr.bf16.mxu0 %v2281_v0 }
  0x72   :  { %2050 = vmatpush3.bf16.msra.mxu0 %v2386_v32 }
  0x73   :  { %2051 = vmatprep.subr.bf16.mxu0 %v2281_v0 }
  0x76   :  { %2053 = vmatpush3.bf16.msra.mxu0 %v2402_v44 }
  0x77   :  { %2054 = vmatprep.subr.bf16.mxu0 %v2281_v0 }
  0x7a   :  { %2056 = vmatpush3.bf16.msra.mxu0 %v2413_v49 }
  0x7b   :  { %2057 = vmatprep.subr.bf16.mxu0 %v2281_v0 }
  0x7e   :  { %2059 = vmatpush3.bf16.msra.mxu0 %v2415_v50 }
  0x7f   :  { %2060 = vmatprep.subr.bf16.mxu0 %v2281_v0 }
  0x82   :  { %2062 = vmatpush3.bf16.msra.mxu0 %v2417_v51 }
  0x83   :  { %2063 = vmatprep.subr.bf16.mxu0 %v2281_v0 }
  0x85   :  { %1685 = vmatmul.mubr.f32.vlgmr.msra.gmra.mrb[0].mxu0 %v117_v52 }
  0x86   :  { %2065 = vmatpush3.bf16.msra.mxu0 %v2471_v27  ;;  %1719 = vmatprep.mubr.msk.f32.mxu0 %vm2282_vm0, %v2283_v4 }
  0x87   :  { %2066 = vmatprep.subr.bf16.mxu0 %v2281_v0 }
  0x8a   :  { %2068 = vmatpush3.bf16.msra.mxu0 %v2473_v28 }
  0x8b   :  { %2069 = vmatprep.subr.bf16.mxu0 %v2281_v0 }
  0x8e   :  { %2071 = vmatpush3.bf16.msra.mxu0 %v2475_v29 }
  0x8f   :  { %2072 = vmatprep.subr.bf16.mxu0 %v2281_v0 }
  0x92   :  { %2074 = vmatpush3.bf16.msra.mxu0 %v2478_v30 }
  0x93   :  { %2075 = vmatprep.subr.bf16.mxu0 %v2281_v0 }
  0x96   :  { %2077 = vmatpush3.bf16.msra.mxu0 %v2480_v33 }
  0x97   :  { %2078 = vmatprep.subr.bf16.mxu0 %v2281_v0 }
  0x9a   :  { %2080 = vmatpush3.bf16.msra.mxu0 %v2482_v36 }
  0x9b   :  { %2081 = vmatprep.subr.bf16.mxu0 %v2281_v0 }
  0x9e   :  { %2083 = vmatpush3.bf16.msra.mxu0 %v2484_v37 }
  0x9f   :  { %2084 = vmatprep.subr.bf16.mxu0 %v2281_v0 }
  0xa2   :  { %2086 = vmatpush3.bf16.msra.mxu0 %v2487_v38 }
  0xa3   :  { %2087 = vmatprep.subr.bf16.mxu0 %v2281_v0 }
  0xa5   :  { %1720 = vmatmul.mubr.f32.vlgmr.msra.gmra.mrb[0].mxu0 %v2383_v31 }
  0xa6   :  { %2089 = vmatpush3.bf16.msra.mxu0 %v2333_v12  ;;  %1754 = vmatprep.mubr.msk.f32.mxu0 %vm2282_vm0, %v2283_v4 }
  0xa7   :  { %2090 = vmatprep.subr.bf16.mxu0 %v2281_v0 }
  0xaa   :  { %2092 = vmatpush3.bf16.msra.mxu0 %v2336_v13 }
  0xab   :  { %2093 = vmatprep.subr.bf16.mxu0 %v2281_v0 }
  0xae   :  { %2095 = vmatpush3.bf16.msra.mxu0 %v2348_v18 }
  0xaf   :  { %2096 = vmatprep.subr.bf16.mxu0 %v2281_v0 }
  0xb2   :  { %2098 = vmatpush3.bf16.msra.mxu0 %v2386_v32 }
  0xb3   :  { %2099 = vmatprep.subr.bf16.mxu0 %v2281_v0 }
  0xb6   :  { %2101 = vmatpush3.bf16.msra.mxu0 %v2402_v44 }
  0xb7   :  { %2102 = vmatprep.subr.bf16.mxu0 %v2281_v0 }
  0xba   :  { %2104 = vmatpush3.bf16.msra.mxu0 %v2413_v49 }
  0xbb   :  { %2105 = vmatprep.subr.bf16.mxu0 %v2281_v0 }
  0xbe   :  { %2107 = vmatpush3.bf16.msra.mxu0 %v2415_v50 }
  0xbf   :  { %2108 = vmatprep.subr.bf16.mxu0 %v2281_v0 }
  0xc2   :  { %2110 = vmatpush3.bf16.msra.mxu0 %v2417_v51 }
  0xc5   :  { %1755 = vmatmul.mubr.f32.vlgmr.msra.gmra.mrb[0].mxu0 %v2383_v31 }
 0x198   :  { %v671_v42 = vpop.f32.mrb[0].mxu0 }
 0x199   :  { %v2651_v52 = vsub.f32 %v2356_v22, %v671_v42  ;;  %v1756_v55 = vpop.f32.mrb[1].mxu0  ;;  %v1341_v22 = vld [vmem:[%s2762_s1] ss:$0 sm:$0xff] }
 0x19b   :  { %v676_v59 = vmul.f32 %v2651_v52, %v2651_v52 }
 0x19d   :  { %v2655_v61 = vand.u32 4294901760, %v676_v59 }
 0x19f   :  { %v759_v62 = vsub.f32 %v676_v59, %v2655_v61 }
 0x1a1   :  { %v760_v63 = vand.u32 4294901760, %v759_v62 }
 0x1a3   :  { %v761_v1 = vsub.f32 %v759_v62, %v760_v63 }
 0x1a5   :  { %v762_v2 = vand.u32 4294901760, %v761_v1 }
 0x1a7   :  { %1790 = vmatmul.mubr.f32.vlgmr.msra.gmra.mrb[0].mxu1 %v762_v2 }
 0x1a8   :  { %2137 = vmatpush3.bf16.msra.mxu1 %v2493_v41  ;;  %1824 = vmatprep.mubr.msk.f32.mxu1 %vm2282_vm0, %v2283_v4 }
 0x1a9   :  { %2138 = vmatprep.subr.bf16.mxu1 %v2281_v0 }
 0x1ac   :  { %2140 = vmatpush3.bf16.msra.mxu1 %v2501_v57 }
 0x1ad   :  { %2141 = vmatprep.subr.bf16.mxu1 %v2281_v0 }
 0x1b0   :  { %2143 = vmatpush3.bf16.msra.mxu1 %v2508_v8 }
 0x1b1   :  { %2144 = vmatprep.subr.bf16.mxu1 %v2281_v0 }
 0x1b4   :  { %2146 = vmatpush3.bf16.msra.mxu1 %v2515_v16 }
 0x1b5   :  { %2147 = vmatprep.subr.bf16.mxu1 %v2281_v0 }
 0x1b8   :  { %2149 = vmatpush3.bf16.msra.mxu1 %v2521_v17 }
 0x1b9   :  { %2150 = vmatprep.subr.bf16.mxu1 %v2281_v0 }
 0x1bc   :  { %2152 = vmatpush3.bf16.msra.mxu1 %v2527_v58 }
 0x1bd   :  { %2153 = vmatprep.subr.bf16.mxu1 %v2281_v0 }
 0x1c0   :  { %2155 = vmatpush3.bf16.msra.mxu1 %v2532_v6 }
 0x1c1   :  { %2156 = vmatprep.subr.bf16.mxu1 %v2281_v0 }
 0x1c4   :  { %2158 = vmatpush3.bf16.msra.mxu1 %v2536_v25 }
 0x1c5   :  { %2159 = vmatprep.subr.bf16.mxu1 %v2281_v0 }
 0x1c7   :  { %1825 = vmatmul.mubr.f32.vlgmr.msra.gmra.mrb[0].mxu1 %v2655_v61 }
 0x1c8   :  { %2161 = vmatpush3.bf16.msra.mxu1 %v2542_v26  ;;  %1859 = vmatprep.mubr.msk.f32.mxu1 %vm2282_vm0, %v2283_v4 }
 0x1c9   :  { %2162 = vmatprep.subr.bf16.mxu1 %v2281_v0 }
 0x1cc   :  { %2164 = vmatpush3.bf16.msra.mxu1 %v2549_v10 }
 0x1cd   :  { %2165 = vmatprep.subr.bf16.mxu1 %v2281_v0 }
 0x1d0   :  { %2167 = vmatpush3.bf16.msra.mxu1 %v2557_v34 }
 0x1d1   :  { %2168 = vmatprep.subr.bf16.mxu1 %v2281_v0 }
 0x1d4   :  { %2170 = vmatpush3.bf16.msra.mxu1 %v2563_v35 }
 0x1d5   :  { %2171 = vmatprep.subr.bf16.mxu1 %v2281_v0 }
 0x1d8   :  { %2173 = vmatpush3.bf16.msra.mxu1 %v2569_v43 }
 0x1d9   :  { %2174 = vmatprep.subr.bf16.mxu1 %v2281_v0 }
 0x1dc   :  { %2176 = vmatpush3.bf16.msra.mxu1 %v2575_v47 }
 0x1dd   :  { %2177 = vmatprep.subr.bf16.mxu1 %v2281_v0 }
 0x1e0   :  { %2179 = vmatpush3.bf16.msra.mxu1 %v2581_v48 }
 0x1e1   :  { %2180 = vmatprep.subr.bf16.mxu1 %v2281_v0 }
 0x1e4   :  { %2182 = vmatpush3.bf16.msra.mxu1 %v2587_v54 }
 0x1e5   :  { %2183 = vmatprep.subr.bf16.mxu1 %v2281_v0 }
 0x1e7   :  { %1860 = vmatmul.mubr.f32.vlgmr.msra.gmra.mrb[0].mxu1 %v759_v62 }
 0x1e8   :  { %2185 = vmatpush3.bf16.msra.mxu1 %v2333_v12  ;;  %1894 = vmatprep.mubr.msk.f32.mxu1 %vm2282_vm0, %v2283_v4 }
 0x1e9   :  { %2186 = vmatprep.subr.bf16.mxu1 %v2281_v0 }
 0x1ec   :  { %2188 = vmatpush3.bf16.msra.mxu1 %v2336_v13 }
 0x1ed   :  { %2189 = vmatprep.subr.bf16.mxu1 %v2281_v0 }
 0x1f0   :  { %2191 = vmatpush3.bf16.msra.mxu1 %v2348_v18 }
 0x1f1   :  { %2192 = vmatprep.subr.bf16.mxu1 %v2281_v0 }
 0x1f4   :  { %2194 = vmatpush3.bf16.msra.mxu1 %v2386_v32 }
 0x1f5   :  { %2195 = vmatprep.subr.bf16.mxu1 %v2281_v0 }
 0x1f8   :  { %2197 = vmatpush3.bf16.msra.mxu1 %v2402_v44 }
 0x1f9   :  { %2198 = vmatprep.subr.bf16.mxu1 %v2281_v0 }
 0x1fc   :  { %2200 = vmatpush3.bf16.msra.mxu1 %v2413_v49 }
 0x1fd   :  { %2201 = vmatprep.subr.bf16.mxu1 %v2281_v0 }
 0x200   :  { %2203 = vmatpush3.bf16.msra.mxu1 %v2415_v50 }
 0x201   :  { %2204 = vmatprep.subr.bf16.mxu1 %v2281_v0 }
 0x204   :  { %2206 = vmatpush3.bf16.msra.mxu1 %v2417_v51 }
 0x205   :  { %2207 = vmatprep.subr.bf16.mxu1 %v2281_v0 }
 0x207   :  { %1895 = vmatmul.mubr.f32.vlgmr.msra.gmra.mrb[0].mxu1 %v760_v63 }
 0x208   :  { %2209 = vmatpush3.bf16.msra.mxu1 %v2471_v27  ;;  %1929 = vmatprep.mubr.msk.f32.mxu1 %vm2282_vm0, %v2283_v4 }
 0x209   :  { %2210 = vmatprep.subr.bf16.mxu1 %v2281_v0 }
 0x20c   :  { %2212 = vmatpush3.bf16.msra.mxu1 %v2473_v28 }
 0x20d   :  { %2213 = vmatprep.subr.bf16.mxu1 %v2281_v0 }
 0x210   :  { %2215 = vmatpush3.bf16.msra.mxu1 %v2475_v29 }
 0x211   :  { %2216 = vmatprep.subr.bf16.mxu1 %v2281_v0 }
 0x214   :  { %2218 = vmatpush3.bf16.msra.mxu1 %v2478_v30 }
 0x215   :  { %2219 = vmatprep.subr.bf16.mxu1 %v2281_v0 }
 0x218   :  { %2221 = vmatpush3.bf16.msra.mxu1 %v2480_v33 }
 0x219   :  { %2222 = vmatprep.subr.bf16.mxu1 %v2281_v0 }
 0x21c   :  { %2224 = vmatpush3.bf16.msra.mxu1 %v2482_v36 }
 0x21d   :  { %2225 = vmatprep.subr.bf16.mxu1 %v2281_v0 }
 0x220   :  { %2227 = vmatpush3.bf16.msra.mxu1 %v2484_v37 }
 0x221   :  { %2228 = vmatprep.subr.bf16.mxu1 %v2281_v0 }
 0x224   :  { %2230 = vmatpush3.bf16.msra.mxu1 %v2487_v38 }
 0x225   :  { %2231 = vmatprep.subr.bf16.mxu1 %v2281_v0 }
 0x227   :  { %1930 = vmatmul.mubr.f32.vlgmr.msra.gmra.mrb[0].mxu1 %v2655_v61 }
 0x228   :  { %2233 = vmatpush3.bf16.msra.mxu1 %v2333_v12  ;;  %1964 = vmatprep.mubr.msk.f32.mxu1 %vm2282_vm0, %v2283_v4 }
 0x229   :  { %2234 = vmatprep.subr.bf16.mxu1 %v2281_v0 }
 0x22c   :  { %2236 = vmatpush3.bf16.msra.mxu1 %v2336_v13 }
 0x22d   :  { %2237 = vmatprep.subr.bf16.mxu1 %v2281_v0 }
 0x230   :  { %2239 = vmatpush3.bf16.msra.mxu1 %v2348_v18 }
 0x231   :  { %2240 = vmatprep.subr.bf16.mxu1 %v2281_v0 }
 0x234   :  { %2242 = vmatpush3.bf16.msra.mxu1 %v2386_v32  ;;  %v1342_v32 = vld [vmem:[%s2763_s2] ss:$0 sm:$0xff] }
 0x235   :  { %2243 = vmatprep.subr.bf16.mxu1 %v2281_v0 }
 0x238   :  { %2245 = vmatpush3.bf16.msra.mxu1 %v2402_v44 }
 0x239   :  { %2246 = vmatprep.subr.bf16.mxu1 %v2281_v0 }
 0x23c   :  { %2248 = vmatpush3.bf16.msra.mxu1 %v2413_v49 }
 0x23d   :  { %2249 = vmatprep.subr.bf16.mxu1 %v2281_v0 }
 0x240   :  { %2251 = vmatpush3.bf16.msra.mxu1 %v2415_v50 }
 0x241   :  { %2252 = vmatprep.subr.bf16.mxu1 %v2281_v0 }
 0x244   :  { %2254 = vmatpush3.bf16.msra.mxu1 %v2417_v51 }
 0x247   :  { %1965 = vmatmul.mubr.f32.vlgmr.msra.gmra.mrb[0].mxu1 %v2655_v61 }
 0x31a   :  { %v1314_v4 = vpop.f32.mrb[0].mxu1 }
 0x31b   :  { %v2255_v12 = vadd.f32 1e-05, %v1314_v4  ;;  %v1966_v13 = vpop.f32.mrb[1].mxu1 }
 0x31d   :  { %2279 = vrsqrt.f32 %v2255_v12 }
 0x327   :  { %v2280_v18 = vpop.eup %2279 }
 0x328   :  { %v1321_v31 = vmul.f32 %v2280_v18, %v2651_v52 }
 0x32a   :  { %v1328_v0 = vmul.f32 %v1341_v22, %v1321_v31 }
 0x32c   :  { %v1335_v44 = vadd.f32 %v1342_v32, %v1328_v0 }
 0x32e   :  { %1336 = vst [vmem:[%s2764_s4] sm:$0xf] %v1335_v44 }

</bundles_post_ra>
